<compile_context>
chip_gen: v6e
topology: v6e:2x2x1
jax: 0.10.0
libtpu: 0.0.40
codegen_flags: <defaults>
</compile_context>

<pallas_src>
import math

import jax
import jax.numpy as jnp
from jax.experimental import pallas as pl
from jax.experimental.pallas import tpu as pltpu


def graphconv_bn_relu_kernel(v_ref, e_ref, w_ref, m_ref, eb_ref, p_ref, o_ref):
    B, N, Fin = v_ref.shape
    Fout = m_ref.shape[-1]

    v = v_ref[...]                                               # (B, N, Fin)

    # --- node projections: two separate MXU dots (W[0], W[1] sliced on the
    # leading axis of one packed ref); the extra MXU push is free, and it
    # avoids a lane-misaligned split of a fused 2*Fout output. f32 operands
    # kept for exactness at these tiny shapes (bf16 cast is the scaling knob).
    w0 = jnp.broadcast_to(w_ref[0][None], (B, Fin, Fout))
    w1 = jnp.broadcast_to(w_ref[1][None], (B, Fin, Fout))
    h0 = jnp.einsum('bni,bio->bno', v, w0, preferred_element_type=jnp.float32)
    h1 = jnp.einsum('bni,bio->bno', v, w1, preferred_element_type=jnp.float32)

    m = m_ref[...][None, :, :]                                   # (1, N, Fout)
    mh0 = m * h0                                                 # (B, N, Fout)
    mh1 = m * h1

    # --- edge features: (e + edge_b), symmetrized — entirely in-kernel.
    ef = e_ref[...] + eb_ref[...][None, :, :]                    # (B, N, N)
    ef = 0.5 * (ef + jnp.swapaxes(ef, 1, 2))

    # Diag / off-diag split via iota masks (VPU); no materialized eye in HBM.
    row = jax.lax.broadcasted_iota(jnp.int32, (N, N), 0)
    col = jax.lax.broadcasted_iota(jnp.int32, (N, N), 1)
    eye = jnp.where(row == col, 1.0, 0.0).astype(jnp.float32)[None, :, :]

    # (ef * I) @ (M*h0)  ==  diag(ef)[..., None] * (M*h0): per-node scale.
    ef_diag = jnp.sum(ef * eye, axis=2, keepdims=True)           # (B, N, 1)
    # (ef * (1-I)) @ (M*h1): batched per-graph matmul (no (B*N,B*N) block-diag).
    ef_off = ef * (1.0 - eye)                                    # (B, N, N)
    out = ef_diag * mh0 + jnp.einsum('bij,bjf->bif', ef_off, mh1,
                                     preferred_element_type=jnp.float32)
    out = out + p_ref[2:3]                                       # + bias, (1,1,Fout)

    # --- BatchNorm1d (training: biased batch stats over B*N nodes per channel,
    # eps=1e-5) folded into one scale/shift, then ReLU. Single-pass stats.
    inv_cnt = 1.0 / (B * N)
    mean = jnp.sum(out, axis=(0, 1), keepdims=True) * inv_cnt        # (1,1,Fout)
    mean_sq = jnp.sum(out * out, axis=(0, 1), keepdims=True) * inv_cnt
    var = mean_sq - mean * mean
    scale = p_ref[0:1] * jax.lax.rsqrt(var + 1e-5)               # gamma * inv_std
    shift = p_ref[1:2] - mean * scale                            # beta - mean*scale
    o_ref[...] = jnp.maximum(out * scale + shift, 0.0)


def graph_conv_forward(v, e, W, M, edge_b, bias, gamma, beta):
    B, N, Fin = v.shape
    Fout = W.shape[-1]

    # gamma / beta / bias packed into a single (3, 1, Fout) VMEM input.
    params = jnp.stack([gamma, beta, bias], axis=0).reshape(3, 1, Fout)

    flops = int(2 * 2 * B * N * Fin * Fout        # two projections
                + 2 * B * N * N * Fout            # off-diagonal batched matmul
                + 12 * B * N * Fout)              # elementwise + BN epilogue
    bytes_accessed = 4 * int(v.size + e.size + W.size + M.size
                             + edge_b.size + params.size + B * N * Fout)
    cost = pl.CostEstimate(flops=flops, transcendentals=int(Fout),
                           bytes_accessed=bytes_accessed)

    vmem = pl.BlockSpec(memory_space=pltpu.MemorySpace.VMEM)
    out = pl.pallas_call(
        graphconv_bn_relu_kernel,
        out_shape=jax.ShapeDtypeStruct((B, N, Fout), jnp.float32),
        in_specs=[vmem] * 6,
        out_specs=vmem,
        compiler_params=pltpu.CompilerParams(vmem_limit_bytes=8 * 1024 * 1024),
        cost_estimate=cost,
    )(v, e, W, M, edge_b, params)
    return out


def init_params(key, in_feature, out_feature, node_number):
    k_w, k_m, k_b = jax.random.split(key, 3)
    gain = 1.414

    # Xavier-uniform (PyTorch convention for a (2, Fin, Fout) tensor)
    fan_in_w = in_feature * out_feature
    fan_out_w = 2 * out_feature
    bound_w = gain * math.sqrt(6.0 / (fan_in_w + fan_out_w))
    W = jax.random.uniform(k_w, (2, in_feature, out_feature),
                           minval=-bound_w, maxval=bound_w, dtype=jnp.float32)

    bound_m = gain * math.sqrt(6.0 / (node_number + out_feature))
    M = jax.random.uniform(k_m, (node_number, out_feature),
                           minval=-bound_m, maxval=bound_m, dtype=jnp.float32)

    edge_b = jnp.full((node_number, node_number), 1e-6, dtype=jnp.float32)

    stdv = 1.0 / math.sqrt(out_feature)
    bias = jax.random.uniform(k_b, (out_feature,),
                              minval=-stdv, maxval=stdv, dtype=jnp.float32)

    gamma = jnp.ones((out_feature,), dtype=jnp.float32)   # BN weight
    beta = jnp.zeros((out_feature,), dtype=jnp.float32)   # BN bias
    return W, M, edge_b, bias, gamma, beta


if __name__ == "__main__":
    B, N, Fin, Fout = 4, 6, 16, 32    # node_number=6 per module default

    key = jax.random.PRNGKey(0)
    k_v, k_e, k_p = jax.random.split(key, 3)

    v = jax.random.normal(k_v, (B, N, Fin), dtype=jnp.float32)        # IMU features
    e = jax.random.uniform(k_e, (B, N, N), dtype=jnp.float32) * 2.0   # UWB distances

    W, M, edge_b, bias, gamma, beta = init_params(k_p, Fin, Fout, N)

    out = graph_conv_forward(v, e, W, M, edge_b, bias, gamma, beta)
    out = jax.block_until_ready(out)
    assert out.shape == (B, N, Fout)
    assert bool(jnp.all(jnp.isfinite(out)))
    print("KERNEL_OK")
</pallas_src>

<mosaic_0001>
module attributes {stable_mosaic.version = 11 : i64} {
  func.func @graphconv_bn_relu_kernel(%arg0: memref<4x6x16xf32, #tpu.memory_space<vmem>>, %arg1: memref<4x6x6xf32, #tpu.memory_space<vmem>>, %arg2: memref<2x16x32xf32, #tpu.memory_space<vmem>>, %arg3: memref<6x32xf32, #tpu.memory_space<vmem>>, %arg4: memref<6x6xf32, #tpu.memory_space<vmem>>, %arg5: memref<3x1x32xf32, #tpu.memory_space<vmem>>, %arg6: memref<4x6x32xf32, #tpu.memory_space<vmem>>) attributes {dimension_semantics = [], scalar_prefetch = 0 : i64, scratch_operands = 0 : i64, tpu.core_type = #tpu.core_type<tc>} {
    %c0 = arith.constant 0 : index
    %c0_0 = arith.constant 0 : index
    %c0_1 = arith.constant 0 : index
    %0 = vector.load %arg0[%c0, %c0_0, %c0_1] : memref<4x6x16xf32, #tpu.memory_space<vmem>>, vector<4x6x16xf32>
    %c0_2 = arith.constant 0 : index
    %c0_3 = arith.constant 0 : index
    %c0_4 = arith.constant 0 : index
    %1 = vector.load %arg2[%c0_2, %c0_3, %c0_4] : memref<2x16x32xf32, #tpu.memory_space<vmem>>, vector<1x16x32xf32>
    %2 = vector.shape_cast %1 : vector<1x16x32xf32> to vector<16x32xf32>
    %3 = vector.shape_cast %2 : vector<16x32xf32> to vector<1x16x32xf32>
    %4 = vector.shape_cast %3 : vector<1x16x32xf32> to vector<1x16x32xf32>
    %5 = vector.broadcast %4 : vector<1x16x32xf32> to vector<4x16x32xf32>
    %c1 = arith.constant 1 : index
    %c0_5 = arith.constant 0 : index
    %c0_6 = arith.constant 0 : index
    %6 = vector.load %arg2[%c1, %c0_5, %c0_6] : memref<2x16x32xf32, #tpu.memory_space<vmem>>, vector<1x16x32xf32>
    %7 = vector.shape_cast %6 : vector<1x16x32xf32> to vector<16x32xf32>
    %8 = vector.shape_cast %7 : vector<16x32xf32> to vector<1x16x32xf32>
    %9 = vector.shape_cast %8 : vector<1x16x32xf32> to vector<1x16x32xf32>
    %10 = vector.broadcast %9 : vector<1x16x32xf32> to vector<4x16x32xf32>
    "tpu.trace_start"() <{level = 10 : i32, message = "bni,bio->bno"}> : () -> ()
    %cst = arith.constant dense<0.000000e+00> : vector<4x6x32xf32>
    %11 = tpu.matmul %0, %5, %cst {dimension_numbers = #tpu.dot_dimension_numbers<[2], [1], [1], [2], [0, 0, 0, 1, 1, 2], [0], [0]>} : vector<4x6x16xf32>, vector<4x16x32xf32>, vector<4x6x32xf32> -> vector<4x6x32xf32>
    %cst_7 = arith.constant dense<0.000000e+00> : vector<4x6x32xf32>
    %12 = tpu.matmul %0, %10, %cst_7 {dimension_numbers = #tpu.dot_dimension_numbers<[2], [1], [1], [2], [0, 0, 0, 1, 1, 2], [0], [0]>} : vector<4x6x16xf32>, vector<4x16x32xf32>, vector<4x6x32xf32> -> vector<4x6x32xf32>
    "tpu.trace_stop"() : () -> ()
    %c0_8 = arith.constant 0 : index
    %c0_9 = arith.constant 0 : index
    %13 = vector.load %arg3[%c0_8, %c0_9] : memref<6x32xf32, #tpu.memory_space<vmem>>, vector<6x32xf32>
    %14 = vector.shape_cast %13 : vector<6x32xf32> to vector<1x6x32xf32>
    %15 = vector.broadcast %14 : vector<1x6x32xf32> to vector<4x6x32xf32>
    %16 = arith.mulf %15, %11 : vector<4x6x32xf32>
    %17 = vector.broadcast %14 : vector<1x6x32xf32> to vector<4x6x32xf32>
    %18 = arith.mulf %17, %12 : vector<4x6x32xf32>
    %c0_10 = arith.constant 0 : index
    %c0_11 = arith.constant 0 : index
    %c0_12 = arith.constant 0 : index
    %19 = vector.load %arg1[%c0_10, %c0_11, %c0_12] : memref<4x6x6xf32, #tpu.memory_space<vmem>>, vector<4x6x6xf32>
    %c0_13 = arith.constant 0 : index
    %c0_14 = arith.constant 0 : index
    %20 = vector.load %arg4[%c0_13, %c0_14] : memref<6x6xf32, #tpu.memory_space<vmem>>, vector<6x6xf32>
    %21 = vector.shape_cast %20 : vector<6x6xf32> to vector<1x6x6xf32>
    %22 = vector.broadcast %21 : vector<1x6x6xf32> to vector<4x6x6xf32>
    %23 = arith.addf %19, %22 : vector<4x6x6xf32>
    %24 = tpu.transpose %23, [0, 2, 1] : vector<4x6x6xf32> -> vector<4x6x6xf32>
    %25 = arith.addf %23, %24 : vector<4x6x6xf32>
    %cst_15 = arith.constant 5.000000e-01 : f32
    %26 = vector.broadcast %cst_15 : f32 to vector<4x6x6xf32>
    %27 = arith.mulf %26, %25 : vector<4x6x6xf32>
    %28 = tpu.iota {dimensions = array<i32: 0>} : vector<6x6xi32>
    %29 = tpu.iota {dimensions = array<i32: 1>} : vector<6x6xi32>
    %30 = arith.cmpi eq, %28, %29 : vector<6x6xi32>
    %cst_16 = arith.constant 1.000000e+00 : f32
    %cst_17 = arith.constant 0.000000e+00 : f32
    %31 = vector.broadcast %cst_16 : f32 to vector<6x6xf32>
    %32 = vector.broadcast %cst_17 : f32 to vector<6x6xf32>
    %33 = arith.select %30, %31, %32 : vector<6x6xi1>, vector<6x6xf32>
    %34 = vector.shape_cast %33 : vector<6x6xf32> to vector<1x6x6xf32>
    %35 = vector.broadcast %34 : vector<1x6x6xf32> to vector<4x6x6xf32>
    %36 = arith.mulf %27, %35 : vector<4x6x6xf32>
    %cst_18 = arith.constant dense<0.000000e+00> : vector<4x6xf32>
    %37 = vector.multi_reduction <add>, %36, %cst_18 [2] : vector<4x6x6xf32> to vector<4x6xf32>
    %38 = vector.shape_cast %37 : vector<4x6xf32> to vector<4x6x1xf32>
    %cst_19 = arith.constant 1.000000e+00 : f32
    %39 = vector.broadcast %cst_19 : f32 to vector<1x6x6xf32>
    %40 = arith.subf %39, %34 : vector<1x6x6xf32>
    %41 = vector.broadcast %40 : vector<1x6x6xf32> to vector<4x6x6xf32>
    %42 = arith.mulf %27, %41 : vector<4x6x6xf32>
    %43 = vector.broadcast %38 : vector<4x6x1xf32> to vector<4x6x32xf32>
    %44 = arith.mulf %43, %16 : vector<4x6x32xf32>
    "tpu.trace_start"() <{level = 10 : i32, message = "bij,bjf->bif"}> : () -> ()
    %cst_20 = arith.constant dense<0.000000e+00> : vector<4x6x32xf32>
    %45 = tpu.matmul %42, %18, %cst_20 {dimension_numbers = #tpu.dot_dimension_numbers<[2], [1], [1], [2], [0, 0, 0, 1, 1, 2], [0], [0]>} : vector<4x6x6xf32>, vector<4x6x32xf32>, vector<4x6x32xf32> -> vector<4x6x32xf32>
    "tpu.trace_stop"() : () -> ()
    %46 = arith.addf %44, %45 : vector<4x6x32xf32>
    %c2 = arith.constant 2 : index
    %c0_21 = arith.constant 0 : index
    %c0_22 = arith.constant 0 : index
    %47 = vector.load %arg5[%c2, %c0_21, %c0_22] : memref<3x1x32xf32, #tpu.memory_space<vmem>>, vector<1x1x32xf32>
    %48 = vector.broadcast %47 : vector<1x1x32xf32> to vector<4x6x32xf32>
    %49 = arith.addf %46, %48 : vector<4x6x32xf32>
    %cst_23 = arith.constant dense<0.000000e+00> : vector<32xf32>
    %50 = vector.multi_reduction <add>, %49, %cst_23 [0, 1] : vector<4x6x32xf32> to vector<32xf32>
    %51 = vector.shape_cast %50 : vector<32xf32> to vector<1x1x32xf32>
    %cst_24 = arith.constant 0.0416666679 : f32
    %52 = vector.broadcast %cst_24 : f32 to vector<1x1x32xf32>
    %53 = arith.mulf %51, %52 : vector<1x1x32xf32>
    %54 = arith.mulf %49, %49 : vector<4x6x32xf32>
    %cst_25 = arith.constant dense<0.000000e+00> : vector<32xf32>
    %55 = vector.multi_reduction <add>, %54, %cst_25 [0, 1] : vector<4x6x32xf32> to vector<32xf32>
    %56 = vector.shape_cast %55 : vector<32xf32> to vector<1x1x32xf32>
    %cst_26 = arith.constant 0.0416666679 : f32
    %57 = vector.broadcast %cst_26 : f32 to vector<1x1x32xf32>
    %58 = arith.mulf %56, %57 : vector<1x1x32xf32>
    %59 = arith.mulf %53, %53 : vector<1x1x32xf32>
    %60 = arith.subf %58, %59 : vector<1x1x32xf32>
    %c0_27 = arith.constant 0 : index
    %c0_28 = arith.constant 0 : index
    %c0_29 = arith.constant 0 : index
    %61 = vector.load %arg5[%c0_27, %c0_28, %c0_29] : memref<3x1x32xf32, #tpu.memory_space<vmem>>, vector<1x1x32xf32>
    %cst_30 = arith.constant 9.99999974E-6 : f32
    %62 = vector.broadcast %cst_30 : f32 to vector<1x1x32xf32>
    %63 = arith.addf %60, %62 : vector<1x1x32xf32>
    %64 = math.rsqrt %63 : vector<1x1x32xf32>
    %65 = arith.mulf %61, %64 : vector<1x1x32xf32>
    %c1_31 = arith.constant 1 : index
    %c0_32 = arith.constant 0 : index
    %c0_33 = arith.constant 0 : index
    %66 = vector.load %arg5[%c1_31, %c0_32, %c0_33] : memref<3x1x32xf32, #tpu.memory_space<vmem>>, vector<1x1x32xf32>
    %67 = arith.mulf %53, %65 : vector<1x1x32xf32>
    %68 = arith.subf %66, %67 : vector<1x1x32xf32>
    %69 = vector.broadcast %65 : vector<1x1x32xf32> to vector<4x6x32xf32>
    %70 = arith.mulf %49, %69 : vector<4x6x32xf32>
    %71 = vector.broadcast %68 : vector<1x1x32xf32> to vector<4x6x32xf32>
    %72 = arith.addf %70, %71 : vector<4x6x32xf32>
    %cst_34 = arith.constant 0.000000e+00 : f32
    %73 = vector.broadcast %cst_34 : f32 to vector<4x6x32xf32>
    %74 = arith.maximumf %72, %73 : vector<4x6x32xf32>
    %c0_35 = arith.constant 0 : index
    %c0_36 = arith.constant 0 : index
    %c0_37 = arith.constant 0 : index
    %75 = vector.load %arg6[%c0_35, %c0_36, %c0_37] : memref<4x6x32xf32, #tpu.memory_space<vmem>>, vector<4x6x32xf32>
    tpu.vector_store %arg6[%c0_35, %c0_36, %c0_37], %74 {strides = array<i32>} : memref<4x6x32xf32, #tpu.memory_space<vmem>>, vector<4x6x32xf32>,
    return
  }
}

</mosaic_0001>

<bundles_post_ra>
// kernel: tpu_custom_call.1
= control target key start
LH: loop header
LB: loop body
LE: loop exit
PB: predicated region body
PF: predicated region fallthrough
CT: control target
= control target key end

     0   :  { %v1321_v0 = vmov 0.0   ;;  %vm32_vm0 = vcmask 130048   ;;  %vm1322_vm1 = vmmov 0   ;;  %v759_v18 = vlaneseq  ;;  %s1510_s2 = inlined_call_operand.vmem [shape: f32[2,16,32], index: 2, kind: input, shape index: {}]   ;;  %s1511_s1 = inlined_call_operand.vmem [shape: f32[4,6,6], index: 1, kind: input, shape index: {}]   ;;  %s1512_s4 = inlined_call_operand.vmem [shape: f32[6,6], index: 4, kind: input, shape index: {}]   ;;  %s1513_s0 = inlined_call_operand.vmem [shape: f32[4,6,16], index: 0, kind: input, shape index: {}]   ;;  %s1514_s3 = inlined_call_operand.vmem [shape: f32[6,32], index: 3, kind: input, shape index: {}]   ;;  %s1515_s5 = inlined_call_operand.vmem [shape: f32[3,1,32], index: 5, kind: input, shape index: {}]   ;;  %s1516_s6 = inlined_call_operand.vmem [shape: f32[4,6,32], index: 6, kind: output, shape index: {}]  }
   0x1   :  { %1241 = vmatprep.subr.mxu0 %v1321_v0  ;;  %1248 = vmatprep.subr.mxu1 %v1321_v0  ;;  %v28_v1 = vld [vmem:[%s1510_s2 + $0x8] sm:$0xff]  ;;  %v27_v2 = vld [vmem:[%s1510_s2] sm:$0xff]  ;;  %v25_v10 = vld [vmem:[%s1513_s0 + $0x10] sm:$0x3f]  ;;  %vm769_vm3 = vcmask 46080   ;;  %vm795_vm4 = vcmask 1045504  }
   0x2   :  { %v614_v3 = vld [vmem:[%s1511_s1] sm:$0x3f]  ;;  %1242 = vmatpush3.msra.mxu0 %v28_v1  ;;  %1249 = vmatpush3.msra.mxu1 %v28_v1  ;;  %v615_v7 = vld [vmem:[%s1511_s1 + $0x8] sm:$0x3f]  ;;  %v26_v11 = vld [vmem:[%s1513_s0 + $0x18] sm:$0x3f] }
   0x3   :  { %v618_v4 = vld [vmem:[%s1512_s4] sm:$0x3f]  ;;  %1243 = vmatprep.subr.mxu0 %v1321_v0  ;;  %1250 = vmatprep.subr.mxu1 %v1321_v0  ;;  %v24_v8 = vld [vmem:[%s1513_s0 + $0x8] sm:$0x3f]  ;;  %v616_v12 = vld [vmem:[%s1511_s1 + $0x10] sm:$0x3f] }
   0x4   :  { %v1374_v5 = vadd.f32 %v618_v4, %v614_v3  ;;  %v23_v6 = vld [vmem:[%s1513_s0] sm:$0x3f]  ;;  %1244 = vmatpush3.msra.mxu0 %v27_v2  ;;  %1245 = vmatprep.mubr.msk.f32.mxu0 %vm1322_vm1, %v1321_v0  ;;  %v1391_v9 = vadd.f32 %v618_v4, %v615_v7  ;;  %v1189_v13 = vld [vmem:[%s1510_s2 + $0x18] sm:$0xff]  ;;  %v621_v14 = vadd.f32 %v618_v4, %v616_v12  ;;  %v1188_v15 = vld [vmem:[%s1510_s2 + $0x10] sm:$0xff]  ;;  %v1449_v19 = vshrl.u32 %v759_v18, 7 }
   0x5   :  { %1251 = vmatpush3.msra.mxu1 %v27_v2  ;;  %1252 = vmatprep.mubr.msk.f32.mxu1 %vm1322_vm1, %v1321_v0  ;;  %v617_v16 = vld [vmem:[%s1511_s1 + $0x18] sm:$0x3f]  ;;  %v762_v20 = vand.u32 127, %v759_v18  ;;  %v605_v42 = vld [vmem:[%s1514_s3] sm:$0x3f]  ;;  %vm791_vm5 = vcmask 48128  }
   0x6   :  { %623 = vxpose.xlu0.b32.start.end [1/1] (short) (narrow) %v1374_v5, 8  ;;  %1246 = vmatmul.mubr.msk.f32.vlgmr.msra.gmra.mxu0 %vm32_vm0, %v23_v6  ;;  %v622_v17 = vadd.f32 %v618_v4, %v617_v16  ;;  %vm1113_vm6 = vcmask 259072  }
   0x7   :  { %1253 = vmatmul.mubr.msk.f32.vlgmr.msra.gmra.mxu1 %vm32_vm0, %v24_v8  ;;  %1255 = vmatprep.subr.mxu0 %v1321_v0  ;;  %vm763_vm2 = vcmp.eq.s32.totalorder %v1449_v19, %v762_v20 }
   0x8   :  { %1262 = vmatprep.subr.mxu1 %v1321_v0  ;;  %1256 = vmatpush3.msra.mxu0 %v28_v1  ;;  %v764_v23 = vsel %vm763_vm2, 1.0, %v1321_v0 }
   0x9   :  { %1263 = vmatpush3.msra.mxu1 %v28_v1  ;;  %1257 = vmatprep.subr.mxu0 %v1321_v0  ;;  %v782_v55 = vsub.f32 1.0, %v764_v23 }
   0xa   :  { %1264 = vmatprep.subr.mxu1 %v1321_v0  ;;  %655 = vxpose.xlu0.b32.start.end [1/1] (short) (narrow) %v1391_v9, 8 }
   0xb   :  { %1258 = vmatpush3.msra.mxu0 %v27_v2  ;;  %1259 = vmatprep.mubr.msk.f32.mxu0 %vm1322_vm1, %v1321_v0 }
   0xc   :  { %1265 = vmatpush3.msra.mxu1 %v27_v2  ;;  %1266 = vmatprep.mubr.msk.f32.mxu1 %vm1322_vm1, %v1321_v0 }
   0xd   :  { %1260 = vmatmul.mubr.msk.f32.vlgmr.msra.gmra.mxu0 %vm32_vm0, %v25_v10  ;;  %1267 = vmatmul.mubr.msk.f32.vlgmr.msra.gmra.mxu1 %vm32_vm0, %v26_v11 }
   0xe   :  { %1269 = vmatprep.subr.mxu0 %v1321_v0  ;;  %1276 = vmatprep.subr.mxu1 %v1321_v0 }
   0xf   :  { %1270 = vmatpush3.msra.mxu0 %v1189_v13  ;;  %1277 = vmatpush3.msra.mxu1 %v1189_v13 }
  0x10   :  { %1271 = vmatprep.subr.mxu0 %v1321_v0  ;;  %1278 = vmatprep.subr.mxu1 %v1321_v0 }
  0x11   :  { %687 = vxpose.xlu1.b32.start.end [1/1] (short) (narrow) %v621_v14, 8  ;;  %1272 = vmatpush3.msra.mxu0 %v1188_v15 }
  0x12   :  { %1273 = vmatprep.mubr.msk.f32.mxu0 %vm1322_vm1, %v1321_v0  ;;  %1279 = vmatpush3.msra.mxu1 %v1188_v15 }
  0x13   :  { %1280 = vmatprep.mubr.msk.f32.mxu1 %vm1322_vm1, %v1321_v0  ;;  %1274 = vmatmul.mubr.msk.f32.vlgmr.msra.gmra.mxu0 %vm32_vm0, %v23_v6 }
  0x14   :  { %1281 = vmatmul.mubr.msk.f32.vlgmr.msra.gmra.mxu1 %vm32_vm0, %v24_v8  ;;  %1283 = vmatprep.subr.mxu0 %v1321_v0 }
  0x15   :  { %1290 = vmatprep.subr.mxu1 %v1321_v0  ;;  %1284 = vmatpush3.msra.mxu0 %v1189_v13 }
  0x16   :  { %1291 = vmatpush3.msra.mxu1 %v1189_v13  ;;  %1285 = vmatprep.subr.mxu0 %v1321_v0 }
  0x17   :  { %1292 = vmatprep.subr.mxu1 %v1321_v0  ;;  %719 = vxpose.xlu1.b32.start.end [1/1] (short) (narrow) %v622_v17, 8 }
  0x18   :  { %1286 = vmatpush3.msra.mxu0 %v1188_v15  ;;  %1287 = vmatprep.mubr.msk.f32.mxu0 %vm1322_vm1, %v1321_v0 }
  0x19   :  { %1293 = vmatpush3.msra.mxu1 %v1188_v15  ;;  %1294 = vmatprep.mubr.msk.f32.mxu1 %vm1322_vm1, %v1321_v0 }
  0x1a   :  { %1288 = vmatmul.mubr.msk.f32.vlgmr.msra.gmra.mxu0 %vm32_vm0, %v25_v10  ;;  %1295 = vmatmul.mubr.msk.f32.vlgmr.msra.gmra.mxu1 %vm32_vm0, %v26_v11 }
  0x1b   :  { %1297 = vmatprep.subr.mxu0 %v1321_v0  ;;  %1302 = vmatprep.subr.mxu1 %v1321_v0 }
  0x1c   :  { %1299 = vmatprep.mubr.msk.f32.mxu0 %vm1322_vm1, %v1321_v0  ;;  %1304 = vmatprep.mubr.msk.f32.mxu1 %vm1322_vm1, %v1321_v0 }
  0x82   :  { %v639_v21 = vpop.trf.xlu0 }
  0x83   :  { %v751_v22 = vadd.f32 %v639_v21, %v1374_v5 }
  0x85   :  { %v755_v24 = vmul.f32 0.5, %v751_v22 }
  0x86   :  { %v671_v25 = vpop.trf.xlu0 }
  0x87   :  { %v752_v26 = vadd.f32 %v671_v25, %v1391_v9  ;;  %v765_v27 = vmul.f32 %v764_v23, %v755_v24  ;;  %v783_v60 = vmul.f32 %v782_v55, %v755_v24 }
  0x89   :  { %v756_v28 = vmul.f32 0.5, %v752_v26  ;;  %v770_v29 = vsel %vm769_vm3, %v765_v27, 0.0 }
  0x8a   :  { %771 = vadd.xlane.f32.xlu0 %v770_v29 }
  0x8b   :  { %v766_v30 = vmul.f32 %v764_v23, %v756_v28  ;;  %v784_v57 = vmul.f32 %v782_v55, %v756_v28 }
  0x8d   :  { %v703_v31 = vpop.trf.xlu1  ;;  %v773_v32 = vsel %vm769_vm3, %v766_v30, 0.0 }
  0x8e   :  { %v753_v33 = vadd.f32 %v703_v31, %v621_v14  ;;  %774 = vadd.xlane.f32.xlu1 %v773_v32 }
  0x90   :  { %v757_v34 = vmul.f32 0.5, %v753_v33 }
  0x92   :  { %v767_v35 = vmul.f32 %v764_v23, %v757_v34  ;;  %v785_v6 = vmul.f32 %v782_v55, %v757_v34 }
  0x93   :  { %v735_v36 = vpop.trf.xlu1 }
  0x94   :  { %v754_v37 = vadd.f32 %v735_v36, %v622_v17  ;;  %v776_v38 = vsel %vm769_vm3, %v767_v35, 0.0 }
  0x95   :  { %777 = vadd.xlane.f32.xlu1 %v776_v38 }
  0x96   :  { %v758_v39 = vmul.f32 0.5, %v754_v37 }
  0x98   :  { %v768_v40 = vmul.f32 %v764_v23, %v758_v39  ;;  %v786_v1 = vmul.f32 %v782_v55, %v758_v39 }
  0x9a   :  { %v779_v41 = vsel %vm769_vm3, %v768_v40, 0.0 }
  0x9b   :  { %780 = vadd.xlane.f32.xlu1 %v779_v41 }
  0xc6   :  { %v102_v43 = vpop.f32.mrf.mxu0 }
  0xc7   :  { %v606_v44 = vmul.f32 %v605_v42, %v102_v43  ;;  %v175_v45 = vpop.f32.mrf.mxu1 }
  0xc8   :  { %v607_v46 = vmul.f32 %v605_v42, %v175_v45  ;;  %v1247_v47 = vpop.f32.mrf.mxu0 }
  0xc9   :  { %v1254_v48 = vpop.f32.mrf.mxu1 }
  0xcd   :  { %v248_v49 = vpop.f32.mrf.mxu0  ;;  %v321_v50 = vpop.f32.mrf.mxu1 }
  0xce   :  { %v608_v51 = vmul.f32 %v605_v42, %v248_v49  ;;  %v609_v52 = vmul.f32 %v605_v42, %v321_v50 }
  0xcf   :  { %v1261_v53 = vpop.f32.mrf.mxu0  ;;  %v1268_v54 = vpop.f32.mrf.mxu1 }
  0xd3   :  { %v391_v56 = vpop.f32.mrf.mxu0 }
  0xd4   :  { %v610_v58 = vmul.f32 %v605_v42, %v391_v56  ;;  %v461_v59 = vpop.f32.mrf.mxu1 }
  0xd5   :  { %v611_v61 = vmul.f32 %v605_v42, %v461_v59  ;;  %v1275_v62 = vpop.f32.mrf.mxu0 }
  0xd6   :  { %v1282_v63 = vpop.f32.mrf.mxu1  ;;  %1298 = vmatpush3.msk.msra.mxu0 %vm795_vm4, %v610_v58 }
  0xd7   :  { %1303 = vmatpush3.msk.msra.mxu1 %vm795_vm4, %v611_v61  ;;  %1300 = vmatmul.mubr.msk.f32.vlgmr.msra.gmra.mxu0 %vm791_vm5, %v783_v60 }
  0xd8   :  { %1305 = vmatmul.mubr.msk.f32.vlgmr.msra.gmra.mxu1 %vm791_vm5, %v784_v57  ;;  %1307 = vmatprep.subr.mxu0 %v1321_v0 }
  0xd9   :  { %1312 = vmatprep.subr.mxu1 %v1321_v0  ;;  %1309 = vmatprep.mubr.msk.f32.mxu0 %vm1322_vm1, %v1321_v0 }
  0xda   :  { %v531_v2 = vpop.f32.mrf.mxu0  ;;  %v601_v3 = vpop.f32.mrf.mxu1  ;;  %1314 = vmatprep.mubr.msk.f32.mxu1 %vm1322_vm1, %v1321_v0  ;;  %v1207_v0 = vld [vmem:[%s1515_s5 + $0x2] ss:$0 sm:$0xff] }
  0xdb   :  { %v612_v4 = vmul.f32 %v605_v42, %v531_v2  ;;  %v613_v5 = vmul.f32 %v605_v42, %v601_v3 }
  0xdc   :  { %v1289_v7 = vpop.f32.mrf.mxu0  ;;  %v1296_v8 = vpop.f32.mrf.mxu1 }
  0xdd   :  { %1308 = vmatpush3.msk.msra.mxu0 %vm795_vm4, %v612_v4  ;;  %1313 = vmatpush3.msk.msra.mxu1 %vm795_vm4, %v613_v5  ;;  %v1159_v7 = vsub.s32 0, %v1449_v19 }
  0xde   :  { %1310 = vmatmul.mubr.msk.f32.vlgmr.msra.gmra.mxu0 %vm791_vm5, %v785_v6  ;;  %1315 = vmatmul.mubr.msk.f32.vlgmr.msra.gmra.mxu1 %vm791_vm5, %v786_v1  ;;  %v1148_v6 = vld [vmem:[%s1515_s5] sm:$0x1] }
 0x113   :  { %v772_v10 = vpop.xlane.xlu0 %771 }
 0x114   :  { %v787_v12 = vmul.f32 %v772_v10, %v606_v44  ;;  %v1208_v10 = vld [vmem:[%s1515_s5 + $0x1] sm:$0x1] }
 0x117   :  { %v775_v9 = vpop.xlane.xlu1 %774 }
 0x118   :  { %v788_v13 = vmul.f32 %v775_v9, %v607_v46 }
 0x11e   :  { %v778_v11 = vpop.xlane.xlu1 %777 }
 0x11f   :  { %v789_v26 = vmul.f32 %v778_v11, %v608_v51 }
 0x124   :  { %v781_v20 = vpop.xlane.xlu1 %780 }
 0x125   :  { %v790_v27 = vmul.f32 %v781_v20, %v609_v52 }
 0x197   :  { %v865_v14 = vpop.f32.mrf.mxu0 }
 0x198   :  { %v1097_v15 = vadd.f32 %v865_v14, %v787_v12  ;;  %v941_v16 = vpop.f32.mrf.mxu1 }
 0x199   :  { %v1098_v17 = vadd.f32 %v941_v16, %v788_v13  ;;  %v1301_v18 = vpop.f32.mrf.mxu0 }
 0x19a   :  { %v1109_v21 = vadd.f32 %v1207_v0, %v1097_v15  ;;  %v1306_v22 = vpop.f32.mrf.mxu1 }
 0x19b   :  { %v1110_v23 = vadd.f32 %v1207_v0, %v1098_v17 }
 0x19c   :  { %v1114_v24 = vsel %vm1113_vm6, %v1109_v21, 0.0  ;;  %v1128_v25 = vmul.f32 %v1109_v21, %v1109_v21 }
 0x19d   :  { %v1115_v28 = vsel %vm1113_vm6, %v1110_v23, 0.0  ;;  %v1129_v29 = vmul.f32 %v1110_v23, %v1110_v23 }
 0x19e   :  { %v1132_v30 = vsel %vm1113_vm6, %v1128_v25, 0.0  ;;  %v1116_v31 = vadd.f32 %v1115_v28, %v1114_v24  ;;  %v1017_v32 = vpop.f32.mrf.mxu0  ;;  %v1093_v33 = vpop.f32.mrf.mxu1 }
 0x19f   :  { %v1133_v34 = vsel %vm1113_vm6, %v1129_v29, 0.0  ;;  %v1099_v35 = vadd.f32 %v1017_v32, %v789_v26  ;;  %v1100_v36 = vadd.f32 %v1093_v33, %v790_v27 }
 0x1a0   :  { %v1134_v37 = vadd.f32 %v1133_v34, %v1132_v30  ;;  %v1311_v38 = vpop.f32.mrf.mxu0  ;;  %v1316_v39 = vpop.f32.mrf.mxu1 }
 0x1a1   :  { %v1111_v40 = vadd.f32 %v1207_v0, %v1099_v35  ;;  %v1112_v41 = vadd.f32 %v1207_v0, %v1100_v36 }
 0x1a3   :  { %v1117_v42 = vsel %vm1113_vm6, %v1111_v40, 0.0  ;;  %v1130_v43 = vmul.f32 %v1111_v40, %v1111_v40  ;;  %v1131_v44 = vmul.f32 %v1112_v41, %v1112_v41  ;;  %v1119_v47 = vsel %vm1113_vm6, %v1112_v41, 0.0 }
 0x1a4   :  { %v1118_v45 = vadd.f32 %v1117_v42, %v1116_v31 }
 0x1a5   :  { %v1135_v46 = vsel %vm1113_vm6, %v1130_v43, 0.0  ;;  %v1137_v50 = vsel %vm1113_vm6, %v1131_v44, 0.0 }
 0x1a6   :  { %v1136_v48 = vadd.f32 %v1135_v46, %v1134_v37  ;;  %v1120_v49 = vadd.f32 %v1119_v47, %v1118_v45 }
 0x1a8   :  { %v1121_v51 = vrot.slane %v1120_v49, 4  ;;  %v1138_v52 = vadd.f32 %v1137_v50, %v1136_v48 }
 0x1aa   :  { %v1122_v53 = vadd.f32 %v1121_v51, %v1120_v49  ;;  %v1139_v54 = vrot.slane %v1138_v52, 4 }
 0x1ac   :  { %v1123_v55 = vrot.slane %v1122_v53, 2  ;;  %v1140_v56 = vadd.f32 %v1139_v54, %v1138_v52 }
 0x1ae   :  { %v1124_v57 = vadd.f32 %v1123_v55, %v1122_v53  ;;  %v1141_v58 = vrot.slane %v1140_v56, 2 }
 0x1b0   :  { %v1125_v59 = vrot.slane %v1124_v57, 1  ;;  %v1142_v60 = vadd.f32 %v1141_v58, %v1140_v56 }
 0x1b2   :  { %v1126_v61 = vadd.f32 %v1125_v59, %v1124_v57  ;;  %v1143_v62 = vrot.slane %v1142_v60, 1 }
 0x1b4   :  { %v1127_v63 = vmul.f32 0.041666668, %v1126_v61  ;;  %v1144_v1 = vadd.f32 %v1143_v62, %v1142_v60 }
 0x1b6   :  { %v1145_v2 = vmul.f32 0.041666668, %v1144_v1  ;;  %v1146_v3 = vmul.f32 %v1127_v63, %v1127_v63 }
 0x1b8   :  { %v1147_v4 = vsub.f32 %v1145_v2, %v1146_v3 }
 0x1ba   :  { %v1149_v5 = vadd.f32 1e-05, %v1147_v4 }
 0x1bc   :  { %1319 = vrsqrt.f32 %v1149_v5 }
 0x1c9   :  { %v1320_v8 = vpop.eup %1319 }
 0x1ca   :  { %v1151_v9 = vmul.f32 %v1320_v8, %v1148_v6 }
 0x1cc   :  { %v1154_v11 = vmul.f32 %v1151_v9, %v1127_v63  ;;  %v1160_v12 = vrot.slane %v1151_v9, %v1159_v7 }
 0x1ce   :  { %v1155_v13 = vsub.f32 %v1208_v10, %v1154_v11  ;;  %v1162_v14 = vmul.f32 %v1160_v12, %v1109_v21  ;;  %v1163_v0 = vmul.f32 %v1160_v12, %v1110_v23  ;;  %v1164_v15 = vmul.f32 %v1160_v12, %v1111_v40 }
 0x1cf   :  { %v1165_v16 = vmul.f32 %v1160_v12, %v1112_v41 }
 0x1d0   :  { %v1170_v17 = vrot.slane %v1155_v13, %v1159_v7 }
 0x1d2   :  { %v1172_v18 = vadd.f32 %v1170_v17, %v1162_v14  ;;  %v1173_v20 = vadd.f32 %v1170_v17, %v1163_v0  ;;  %v1174_v22 = vadd.f32 %v1170_v17, %v1164_v15  ;;  %v1175_v24 = vadd.f32 %v1170_v17, %v1165_v16 }
 0x1d4   :  { %v1176_v25 = vmax.f32 %v1172_v18, 0.0  ;;  %v1177_v19 = vmax.f32 %v1173_v20, 0.0  ;;  %v1178_v26 = vmax.f32 %v1174_v22, 0.0  ;;  %v1179_v27 = vmax.f32 %v1175_v24, 0.0 }
 0x1d6   :  { %1180 = vst.msk [vmem:[%s1516_s6] sm:$0x3f] %vm1113_vm6, %v1176_v25  ;;  %1181 = vst.msk [vmem:[%s1516_s6 + $0x8] sm:$0x3f] %vm1113_vm6, %v1177_v19 }
 0x1d7   :  { %1182 = vst.msk [vmem:[%s1516_s6 + $0x10] sm:$0x3f] %vm1113_vm6, %v1178_v26  ;;  %1183 = vst.msk [vmem:[%s1516_s6 + $0x18] sm:$0x3f] %vm1113_vm6, %v1179_v27 }

</bundles_post_ra>
